<compile_context>
chip_gen: v5e
topology: v5e:2x2
jax: 0.10.0
libtpu: 0.0.40
codegen_flags: <defaults>
</compile_context>

<pallas_src>
import functools
import math

import jax
import jax.numpy as jnp
from jax.experimental import pallas as pl
from jax.experimental.pallas import tpu as pltpu

# ----------------------------- model config (small) -----------------------------
HIDDEN = 32
N_LAYERS = 2
N_HEADS = 2
HEAD_DIM = HIDDEN // N_HEADS
INTERMEDIATE = 64
VOCAB = 128
MAX_POS = 64
TYPE_VOCAB = 2
N_CLASSES = 2
LN_EPS = 1e-12


# ----------------------------- in-kernel helpers ---------------------------------


def _ln_f32(x, g, b, eps):
    mean = jnp.mean(x, axis=-1, keepdims=True)
    var = jnp.mean((x - mean) ** 2, axis=-1, keepdims=True)
    return (x - mean) * jax.lax.rsqrt(var + eps) * g + b


def _gelu_tanh(y):
    # TODO(synk): HF BERT default is exact erf-GELU; tanh approximation used here.
    c = 0.7978845608028654  # sqrt(2/pi)
    return 0.5 * y * (1.0 + jnp.tanh(c * (y + 0.044715 * y * y * y)))


# ----------------------------- fused encoder kernel ------------------------------


def _encoder_kernel(
    x_ref, mask_ref, eg_ref, eb_ref,
    wqkv_ref, wo_ref, wi_ref, wo2_ref, vec_ref,
    o_ref,
    *, n_heads, head_dim, inter, eps,
):
    H = n_heads * head_dim
    layer = pl.program_id(0)

    # Grid step 0: apply the embedding LayerNorm; the output block (constant index
    # across the layer axis) then serves as the VMEM-resident activation slab.
    @pl.when(layer == 0)
    def _():
        o_ref[...] = _ln_f32(
            x_ref[...].astype(jnp.float32), eg_ref[...], eb_ref[...], eps
        )

    x = o_ref[...]  # (B*S, H) f32, resident across layers

    # Packed per-layer bias/LN vectors: load once per grid step, slice as a value.
    vec = vec_ref[...]                     # (8, 3H)
    bqkv = vec[0:1, :]                     # (1, 3H)  (1/sqrt(Dh) folded into b_q)
    bo = vec[1:2, :H]
    ln1g = vec[2:3, :H]
    ln1b = vec[3:4, :H]
    bi = vec[4:5, :inter]
    bo2 = vec[5:6, :H]
    ln2g = vec[6:7, :H]
    ln2b = vec[7:8, :H]

    # ---- fused QKV projection (single MXU matmul, lane width 3H), kept in registers --
    # 1/sqrt(head_dim) is pre-folded into W_q / b_q, so no score scaling below.
    qkv = jnp.dot(x, wqkv_ref[...], preferred_element_type=jnp.float32) + bqkv

    # ---- attention over all rows at once; mask is block-diagonal per sequence --------
    mask = mask_ref[...]                   # (B*S, B*S) additive
    heads = []
    for h in range(n_heads):
        c = h * head_dim
        q = qkv[:, c:c + head_dim]                         # (M, Dh)
        k = qkv[:, H + c:H + c + head_dim]                 # (M, Dh)
        v = qkv[:, 2 * H + c:2 * H + c + head_dim]         # (M, Dh)
        # q @ k^T without an explicit transpose (contract on the Dh axes).
        s = jax.lax.dot_general(
            q, k, (((1,), (1,)), ((), ())),
            preferred_element_type=jnp.float32,
        ) + mask                                           # (M, M)
        m = jnp.max(s, axis=-1, keepdims=True)
        e = jnp.exp(s - m)
        p = e * pl.reciprocal(jnp.sum(e, axis=-1, keepdims=True), approx=True)
        heads.append(jnp.dot(p, v, preferred_element_type=jnp.float32))
    ctx = jnp.concatenate(heads, axis=-1)                  # (M, H), register-resident

    # ---- attention output projection + residual + LayerNorm (fused epilogue) --------
    attn = jnp.dot(ctx, wo_ref[...], preferred_element_type=jnp.float32) + bo
    x = _ln_f32(attn + x, ln1g, ln1b, eps)

    # ---- FFN (wi + GELU + wo2) + residual + LayerNorm (fused) -----------------------
    up = jnp.dot(x, wi_ref[...], preferred_element_type=jnp.float32) + bi
    up = _gelu_tanh(up)
    down = jnp.dot(up, wo2_ref[...], preferred_element_type=jnp.float32) + bo2
    x = _ln_f32(down + x, ln2g, ln2b, eps)

    # Carry to the next layer via the resident output block (single slab store).
    o_ref[...] = x.astype(o_ref.dtype)


def encoder(x2, mask_add, emb_ln_g, emb_ln_b, stacked):
    """x2: (B*S, H); mask_add: (B*S, B*S) additive; returns (B*S, H)."""
    M, H = x2.shape
    L = stacked["wqkv"].shape[0]
    I = stacked["wi"].shape[-1]

    kernel = functools.partial(
        _encoder_kernel, n_heads=N_HEADS, head_dim=HEAD_DIM, inter=I, eps=LN_EPS
    )

    # Advisory cost estimate (model is launch/overhead bound; helps XLA schedule the
    # gathers / pooler around the custom call).
    per_layer_flops = (
        2 * M * H * 3 * H                         # fused QKV
        + N_HEADS * 2 * (2 * M * M * HEAD_DIM)    # q@k^T and p@v
        + 2 * M * H * H                           # wo
        + 2 * M * H * I + 2 * M * I * H           # FFN
    )
    per_layer_transc = N_HEADS * M * M + M * I + 6 * M   # exp, tanh, rsqrt, recip
    weight_bytes = 4 * L * (H * 3 * H + H * H + H * I + I * H + 8 * 3 * H)
    cost = pl.CostEstimate(
        flops=L * per_layer_flops,
        transcendentals=L * per_layer_transc + 2 * M,
        bytes_accessed=weight_bytes + 4 * (M * H + M * M + 2 * H + M * H),
    )

    return pl.pallas_call(
        kernel,
        out_shape=jax.ShapeDtypeStruct((M, H), x2.dtype),
        grid=(L,),
        in_specs=[
            pl.BlockSpec((M, H), lambda l: (0, 0)),               # x (embeddings)
            pl.BlockSpec((M, M), lambda l: (0, 0)),               # additive mask
            pl.BlockSpec((1, H), lambda l: (0, 0)),               # emb LN gamma
            pl.BlockSpec((1, H), lambda l: (0, 0)),               # emb LN beta
            pl.BlockSpec((None, H, 3 * H), lambda l: (l, 0, 0)),  # wqkv
            pl.BlockSpec((None, H, H), lambda l: (l, 0, 0)),      # wo
            pl.BlockSpec((None, H, I), lambda l: (l, 0, 0)),      # wi
            pl.BlockSpec((None, I, H), lambda l: (l, 0, 0)),      # wo2
            pl.BlockSpec((None, 8, 3 * H), lambda l: (l, 0, 0)),  # packed bias/LN vecs
        ],
        out_specs=pl.BlockSpec((M, H), lambda l: (0, 0)),
        compiler_params=pltpu.CompilerParams(
            # Layer axis carries state through the resident output block -> sequential.
            dimension_semantics=("arbitrary",),
        ),
        cost_estimate=cost,
    )(
        x2, mask_add, emb_ln_g, emb_ln_b,
        stacked["wqkv"], stacked["wo"], stacked["wi"], stacked["wo2"], stacked["vec"],
    )


# ----------------------------- parameter init ------------------------------------


def init_params(key):
    def nrm(k, shape):
        return jax.random.normal(k, shape, jnp.float32) * 0.02

    keys = iter(jax.random.split(key, 200))
    params = {
        "word_emb": nrm(next(keys), (VOCAB, HIDDEN)),
        "pos_emb": nrm(next(keys), (MAX_POS, HIDDEN)),
        "type_emb": nrm(next(keys), (TYPE_VOCAB, HIDDEN)),
        "emb_ln_g": jnp.ones((HIDDEN,), jnp.float32),
        "emb_ln_b": jnp.zeros((HIDDEN,), jnp.float32),
        "pooler_w": nrm(next(keys), (HIDDEN, HIDDEN)),
        "pooler_b": jnp.zeros((HIDDEN,), jnp.float32),
        "cls_w": nrm(next(keys), (HIDDEN, N_CLASSES)),
        "cls_b": jnp.zeros((N_CLASSES,), jnp.float32),
        "layers": [],
    }
    for _ in range(N_LAYERS):
        params["layers"].append(
            {
                "wq": nrm(next(keys), (HIDDEN, HIDDEN)), "bq": jnp.zeros((HIDDEN,), jnp.float32),
                "wk": nrm(next(keys), (HIDDEN, HIDDEN)), "bk": jnp.zeros((HIDDEN,), jnp.float32),
                "wv": nrm(next(keys), (HIDDEN, HIDDEN)), "bv": jnp.zeros((HIDDEN,), jnp.float32),
                "wo": nrm(next(keys), (HIDDEN, HIDDEN)), "bo": jnp.zeros((HIDDEN,), jnp.float32),
                "ln1_g": jnp.ones((HIDDEN,), jnp.float32), "ln1_b": jnp.zeros((HIDDEN,), jnp.float32),
                "wi": nrm(next(keys), (HIDDEN, INTERMEDIATE)), "bi": jnp.zeros((INTERMEDIATE,), jnp.float32),
                "wo2": nrm(next(keys), (INTERMEDIATE, HIDDEN)), "bo2": jnp.zeros((HIDDEN,), jnp.float32),
                "ln2_g": jnp.ones((HIDDEN,), jnp.float32), "ln2_b": jnp.zeros((HIDDEN,), jnp.float32),
            }
        )
    return params


def _stack_layers(params):
    """Stack per-layer weights along a leading layer axis.

    1/sqrt(Dh) is folded into W_q / b_q; the eight (1,H)/(1,I) bias/LN vectors of each
    layer are packed into one (8, 3H) slab so each grid step DMAs 5 weight blocks
    instead of 12.
    """
    scale = 1.0 / math.sqrt(HEAD_DIM)

    def pack_vec(lp):
        v = jnp.zeros((8, 3 * HIDDEN), jnp.float32)
        v = v.at[0, :].set(jnp.concatenate([lp["bq"] * scale, lp["bk"], lp["bv"]]))
        v = v.at[1, :HIDDEN].set(lp["bo"])
        v = v.at[2, :HIDDEN].set(lp["ln1_g"])
        v = v.at[3, :HIDDEN].set(lp["ln1_b"])
        v = v.at[4, :INTERMEDIATE].set(lp["bi"])
        v = v.at[5, :HIDDEN].set(lp["bo2"])
        v = v.at[6, :HIDDEN].set(lp["ln2_g"])
        v = v.at[7, :HIDDEN].set(lp["ln2_b"])
        return v

    def stack(fn):
        return jnp.stack([fn(lp) for lp in params["layers"]], axis=0)

    return {
        "wqkv": stack(lambda lp: jnp.concatenate(
            [lp["wq"] * scale, lp["wk"], lp["wv"]], axis=1)),   # (L, H, 3H)
        "wo": stack(lambda lp: lp["wo"]),                        # (L, H, H)
        "wi": stack(lambda lp: lp["wi"]),                        # (L, H, I)
        "wo2": stack(lambda lp: lp["wo2"]),                      # (L, I, H)
        "vec": stack(pack_vec),                                  # (L, 8, 3H)
    }


# ----------------------------- forward pass ---------------------------------------


def custom_bert_forward(params, input_ids, attention_mask):
    B, S = input_ids.shape
    M = B * S

    # Embeddings (gathers kept in plain JAX glue). token_type_ids default to zeros,
    # matching the reference forward(input_ids, attention_mask) call.
    we = jnp.take(params["word_emb"], input_ids, axis=0)                     # (B, S, H)
    pe = params["pos_emb"][:S][None, :, :]                                   # (1, S, H)
    te = jnp.take(params["type_emb"], jnp.zeros((B, S), jnp.int32), axis=0)  # (B, S, H)
    x = (we + pe + te).astype(jnp.float32).reshape(M, HIDDEN)

    # (B*S, B*S) additive mask: HF-style key padding mask broadcast over queries, plus
    # block-diagonal masking so tokens never attend across batch entries when attention
    # is computed as one matmul over all rows.
    key_pad = (1.0 - attention_mask.astype(jnp.float32)).reshape(1, M) * -10000.0
    block = jnp.kron(jnp.eye(B, dtype=jnp.float32), jnp.ones((S, S), jnp.float32))
    mask_add = (1.0 - block) * -10000.0 + key_pad                            # (M, M)

    stacked = _stack_layers(params)
    x = encoder(
        x, mask_add,
        params["emb_ln_g"].reshape(1, HIDDEN),
        params["emb_ln_b"].reshape(1, HIDDEN),
        stacked,
    )                                                                        # (B*S, H)

    # Pooler + classifier: plain XLA (per perf review — a pallas_call here is pure
    # dispatch overhead and a lane-width-2 masked store; XLA fuses these for free).
    cls = x.reshape(B, S, HIDDEN)[:, 0, :]
    pooled = jnp.tanh(cls @ params["pooler_w"] + params["pooler_b"])
    logits = pooled @ params["cls_w"] + params["cls_b"]
    return logits


# ----------------------------- main ------------------------------------------------

if __name__ == "__main__":
    key = jax.random.PRNGKey(0)
    kp, kid = jax.random.split(key)
    params = init_params(kp)

    B, S = 2, 8
    input_ids = jax.random.randint(kid, (B, S), 0, VOCAB, dtype=jnp.int32)
    # mask out the last two tokens of the second sequence
    attention_mask = jnp.array(
        [[1, 1, 1, 1, 1, 1, 1, 1],
         [1, 1, 1, 1, 1, 1, 0, 0]], dtype=jnp.int32)

    fwd = jax.jit(functools.partial(custom_bert_forward, params))
    logits = fwd(input_ids, attention_mask)
    jax.block_until_ready(logits)
    assert logits.shape == (B, N_CLASSES)
    assert bool(jnp.all(jnp.isfinite(logits)))
    print("KERNEL_OK")
</pallas_src>

<mosaic_0001>
module attributes {stable_mosaic.version = 11 : i64} {
  func.func @_encoder_kernel(%arg0: i32, %arg1: memref<16x32xf32, #tpu.memory_space<vmem>>, %arg2: memref<16x16xf32, #tpu.memory_space<vmem>>, %arg3: memref<1x32xf32, #tpu.memory_space<vmem>>, %arg4: memref<1x32xf32, #tpu.memory_space<vmem>>, %arg5: memref<1x32x96xf32, #tpu.memory_space<vmem>>, %arg6: memref<1x32x32xf32, #tpu.memory_space<vmem>>, %arg7: memref<1x32x64xf32, #tpu.memory_space<vmem>>, %arg8: memref<1x64x32xf32, #tpu.memory_space<vmem>>, %arg9: memref<1x8x96xf32, #tpu.memory_space<vmem>>, %arg10: memref<16x32xf32, #tpu.memory_space<vmem>>) attributes {dimension_semantics = [#tpu.dimension_semantics<arbitrary>], iteration_bounds = array<i64: 2>, scalar_prefetch = 0 : i64, scratch_operands = 0 : i64, tpu.core_type = #tpu.core_type<tc>, window_params = [{pipeline_mode = #tpu.pipeline_mode<synchronous>, transform_indices = @transform_0, window_bounds = array<i64: 16, 32>}, {pipeline_mode = #tpu.pipeline_mode<synchronous>, transform_indices = @transform_1, window_bounds = array<i64: 16, 16>}, {pipeline_mode = #tpu.pipeline_mode<synchronous>, transform_indices = @transform_2, window_bounds = array<i64: 1, 32>}, {pipeline_mode = #tpu.pipeline_mode<synchronous>, transform_indices = @transform_3, window_bounds = array<i64: 1, 32>}, {transform_indices = @transform_4, window_bounds = array<i64: 1, 32, 96>}, {transform_indices = @transform_5, window_bounds = array<i64: 1, 32, 32>}, {transform_indices = @transform_6, window_bounds = array<i64: 1, 32, 64>}, {transform_indices = @transform_7, window_bounds = array<i64: 1, 64, 32>}, {transform_indices = @transform_8, window_bounds = array<i64: 1, 8, 96>}, {pipeline_mode = #tpu.pipeline_mode<synchronous>, transform_indices = @transform_9, window_bounds = array<i64: 16, 32>}]} {
    %c0_i32 = arith.constant 0 : i32
    %0 = arith.cmpi eq, %arg0, %c0_i32 : i32
    %1 = arith.extui %0 : i1 to i32
    %c0_i32_0 = arith.constant 0 : i32
    %2 = arith.cmpi ne, %1, %c0_i32_0 : i32
    scf.if %2 {
      %c0_46 = arith.constant 0 : index
      %c0_47 = arith.constant 0 : index
      %128 = vector.load %arg1[%c0_46, %c0_47] : memref<16x32xf32, #tpu.memory_space<vmem>>, vector<16x32xf32>
      %c0_48 = arith.constant 0 : index
      %c0_49 = arith.constant 0 : index
      %129 = vector.load %arg3[%c0_48, %c0_49] : memref<1x32xf32, #tpu.memory_space<vmem>>, vector<1x32xf32>
      %c0_50 = arith.constant 0 : index
      %c0_51 = arith.constant 0 : index
      %130 = vector.load %arg4[%c0_50, %c0_51] : memref<1x32xf32, #tpu.memory_space<vmem>>, vector<1x32xf32>
      %cst_52 = arith.constant dense<0.000000e+00> : vector<16xf32>
      %131 = vector.multi_reduction <add>, %128, %cst_52 [1] : vector<16x32xf32> to vector<16xf32>
      %132 = vector.shape_cast %131 : vector<16xf32> to vector<16x1xf32>
      %cst_53 = arith.constant 3.200000e+01 : f32
      %133 = vector.broadcast %cst_53 : f32 to vector<16x1xf32>
      %134 = arith.divf %132, %133 : vector<16x1xf32>
      %135 = vector.broadcast %134 : vector<16x1xf32> to vector<16x32xf32>
      %136 = arith.subf %128, %135 : vector<16x32xf32>
      %137 = arith.mulf %136, %136 : vector<16x32xf32>
      %cst_54 = arith.constant dense<0.000000e+00> : vector<16xf32>
      %138 = vector.multi_reduction <add>, %137, %cst_54 [1] : vector<16x32xf32> to vector<16xf32>
      %139 = vector.shape_cast %138 : vector<16xf32> to vector<16x1xf32>
      %cst_55 = arith.constant 3.200000e+01 : f32
      %140 = vector.broadcast %cst_55 : f32 to vector<16x1xf32>
      %141 = arith.divf %139, %140 : vector<16x1xf32>
      %142 = vector.broadcast %134 : vector<16x1xf32> to vector<16x32xf32>
      %143 = arith.subf %128, %142 : vector<16x32xf32>
      %cst_56 = arith.constant 9.99999996E-13 : f32
      %144 = vector.broadcast %cst_56 : f32 to vector<16x1xf32>
      %145 = arith.addf %141, %144 : vector<16x1xf32>
      %146 = math.rsqrt %145 : vector<16x1xf32>
      %147 = vector.broadcast %146 : vector<16x1xf32> to vector<16x32xf32>
      %148 = arith.mulf %143, %147 : vector<16x32xf32>
      %149 = vector.broadcast %129 : vector<1x32xf32> to vector<16x32xf32>
      %150 = arith.mulf %148, %149 : vector<16x32xf32>
      %151 = vector.broadcast %130 : vector<1x32xf32> to vector<16x32xf32>
      %152 = arith.addf %150, %151 : vector<16x32xf32>
      %c0_57 = arith.constant 0 : index
      %c0_58 = arith.constant 0 : index
      %153 = vector.load %arg10[%c0_57, %c0_58] : memref<16x32xf32, #tpu.memory_space<vmem>>, vector<16x32xf32>
      tpu.vector_store %arg10[%c0_57, %c0_58], %152 {strides = array<i32>} : memref<16x32xf32, #tpu.memory_space<vmem>>, vector<16x32xf32>,
    } else {
    }
    %c0 = arith.constant 0 : index
    %c0_1 = arith.constant 0 : index
    %3 = vector.load %arg10[%c0, %c0_1] : memref<16x32xf32, #tpu.memory_space<vmem>>, vector<16x32xf32>
    %c0_2 = arith.constant 0 : index
    %c0_3 = arith.constant 0 : index
    %c0_4 = arith.constant 0 : index
    %4 = vector.load %arg9[%c0_2, %c0_3, %c0_4] : memref<1x8x96xf32, #tpu.memory_space<vmem>>, vector<1x8x96xf32>
    %5 = vector.shape_cast %4 : vector<1x8x96xf32> to vector<8x96xf32>
    %6 = vector.extract_strided_slice %5 {offsets = [0, 0], sizes = [1, 96], strides = [1, 1]} : vector<8x96xf32> to vector<1x96xf32>
    %7 = vector.extract_strided_slice %5 {offsets = [1, 0], sizes = [1, 32], strides = [1, 1]} : vector<8x96xf32> to vector<1x32xf32>
    %8 = vector.extract_strided_slice %5 {offsets = [2, 0], sizes = [1, 32], strides = [1, 1]} : vector<8x96xf32> to vector<1x32xf32>
    %9 = vector.extract_strided_slice %5 {offsets = [3, 0], sizes = [1, 32], strides = [1, 1]} : vector<8x96xf32> to vector<1x32xf32>
    %10 = vector.extract_strided_slice %5 {offsets = [4, 0], sizes = [1, 64], strides = [1, 1]} : vector<8x96xf32> to vector<1x64xf32>
    %11 = vector.extract_strided_slice %5 {offsets = [5, 0], sizes = [1, 32], strides = [1, 1]} : vector<8x96xf32> to vector<1x32xf32>
    %12 = vector.extract_strided_slice %5 {offsets = [6, 0], sizes = [1, 32], strides = [1, 1]} : vector<8x96xf32> to vector<1x32xf32>
    %13 = vector.extract_strided_slice %5 {offsets = [7, 0], sizes = [1, 32], strides = [1, 1]} : vector<8x96xf32> to vector<1x32xf32>
    %c0_5 = arith.constant 0 : index
    %c0_6 = arith.constant 0 : index
    %c0_7 = arith.constant 0 : index
    %14 = vector.load %arg5[%c0_5, %c0_6, %c0_7] : memref<1x32x96xf32, #tpu.memory_space<vmem>>, vector<1x32x96xf32>
    %15 = vector.shape_cast %14 : vector<1x32x96xf32> to vector<32x96xf32>
    %cst = arith.constant dense<0.000000e+00> : vector<16x96xf32>
    %16 = tpu.matmul %3, %15, %cst {dimension_numbers = #tpu.dot_dimension_numbers<[1], [0], [0], [1], [0, 0, 1, 1], [], []>} : vector<16x32xf32>, vector<32x96xf32>, vector<16x96xf32> -> vector<16x96xf32>
    %17 = vector.broadcast %6 : vector<1x96xf32> to vector<16x96xf32>
    %18 = arith.addf %16, %17 : vector<16x96xf32>
    %c0_8 = arith.constant 0 : index
    %c0_9 = arith.constant 0 : index
    %19 = vector.load %arg2[%c0_8, %c0_9] : memref<16x16xf32, #tpu.memory_space<vmem>>, vector<16x16xf32>
    %20 = vector.extract_strided_slice %18 {offsets = [0, 0], sizes = [16, 16], strides = [1, 1]} : vector<16x96xf32> to vector<16x16xf32>
    %21 = vector.extract_strided_slice %18 {offsets = [0, 32], sizes = [16, 16], strides = [1, 1]} : vector<16x96xf32> to vector<16x16xf32>
    %22 = vector.extract_strided_slice %18 {offsets = [0, 64], sizes = [16, 16], strides = [1, 1]} : vector<16x96xf32> to vector<16x16xf32>
    %cst_10 = arith.constant dense<0.000000e+00> : vector<16x16xf32>
    %23 = tpu.matmul %20, %21, %cst_10 {dimension_numbers = #tpu.dot_dimension_numbers<[1], [1], [0], [0], [0, 0, 1, 0], [], []>} : vector<16x16xf32>, vector<16x16xf32>, vector<16x16xf32> -> vector<16x16xf32>
    %24 = arith.addf %23, %19 : vector<16x16xf32>
    %cst_11 = arith.constant dense<0xFF800000> : vector<16xf32>
    %25 = vector.multi_reduction <maximumf>, %24, %cst_11 [1] : vector<16x16xf32> to vector<16xf32>
    %26 = vector.shape_cast %25 : vector<16xf32> to vector<16x1xf32>
    %27 = vector.broadcast %26 : vector<16x1xf32> to vector<16x16xf32>
    %28 = arith.subf %24, %27 : vector<16x16xf32>
    %29 = math.exp %28 : vector<16x16xf32>
    %cst_12 = arith.constant dense<0.000000e+00> : vector<16xf32>
    %30 = vector.multi_reduction <add>, %29, %cst_12 [1] : vector<16x16xf32> to vector<16xf32>
    %31 = vector.shape_cast %30 : vector<16xf32> to vector<16x1xf32>
    %32 = tpu.reciprocal %31 {approx = true} : vector<16x1xf32> -> vector<16x1xf32>
    %33 = vector.broadcast %32 : vector<16x1xf32> to vector<16x16xf32>
    %34 = arith.mulf %29, %33 : vector<16x16xf32>
    %cst_13 = arith.constant dense<0.000000e+00> : vector<16x16xf32>
    %35 = tpu.matmul %34, %22, %cst_13 {dimension_numbers = #tpu.dot_dimension_numbers<[1], [0], [0], [1], [0, 0, 1, 1], [], []>} : vector<16x16xf32>, vector<16x16xf32>, vector<16x16xf32> -> vector<16x16xf32>
    %36 = vector.extract_strided_slice %18 {offsets = [0, 16], sizes = [16, 16], strides = [1, 1]} : vector<16x96xf32> to vector<16x16xf32>
    %37 = vector.extract_strided_slice %18 {offsets = [0, 48], sizes = [16, 16], strides = [1, 1]} : vector<16x96xf32> to vector<16x16xf32>
    %38 = vector.extract_strided_slice %18 {offsets = [0, 80], sizes = [16, 16], strides = [1, 1]} : vector<16x96xf32> to vector<16x16xf32>
    %cst_14 = arith.constant dense<0.000000e+00> : vector<16x16xf32>
    %39 = tpu.matmul %36, %37, %cst_14 {dimension_numbers = #tpu.dot_dimension_numbers<[1], [1], [0], [0], [0, 0, 1, 0], [], []>} : vector<16x16xf32>, vector<16x16xf32>, vector<16x16xf32> -> vector<16x16xf32>
    %40 = arith.addf %39, %19 : vector<16x16xf32>
    %cst_15 = arith.constant dense<0xFF800000> : vector<16xf32>
    %41 = vector.multi_reduction <maximumf>, %40, %cst_15 [1] : vector<16x16xf32> to vector<16xf32>
    %42 = vector.shape_cast %41 : vector<16xf32> to vector<16x1xf32>
    %43 = vector.broadcast %42 : vector<16x1xf32> to vector<16x16xf32>
    %44 = arith.subf %40, %43 : vector<16x16xf32>
    %45 = math.exp %44 : vector<16x16xf32>
    %cst_16 = arith.constant dense<0.000000e+00> : vector<16xf32>
    %46 = vector.multi_reduction <add>, %45, %cst_16 [1] : vector<16x16xf32> to vector<16xf32>
    %47 = vector.shape_cast %46 : vector<16xf32> to vector<16x1xf32>
    %48 = tpu.reciprocal %47 {approx = true} : vector<16x1xf32> -> vector<16x1xf32>
    %49 = vector.broadcast %48 : vector<16x1xf32> to vector<16x16xf32>
    %50 = arith.mulf %45, %49 : vector<16x16xf32>
    %cst_17 = arith.constant dense<0.000000e+00> : vector<16x16xf32>
    %51 = tpu.matmul %50, %38, %cst_17 {dimension_numbers = #tpu.dot_dimension_numbers<[1], [0], [0], [1], [0, 0, 1, 1], [], []>} : vector<16x16xf32>, vector<16x16xf32>, vector<16x16xf32> -> vector<16x16xf32>
    %52 = tpu.concatenate %35, %51 in 1 : vector<16x16xf32>, vector<16x16xf32> -> vector<16x32xf32>
    %c0_18 = arith.constant 0 : index
    %c0_19 = arith.constant 0 : index
    %c0_20 = arith.constant 0 : index
    %53 = vector.load %arg6[%c0_18, %c0_19, %c0_20] : memref<1x32x32xf32, #tpu.memory_space<vmem>>, vector<1x32x32xf32>
    %54 = vector.shape_cast %53 : vector<1x32x32xf32> to vector<32x32xf32>
    %cst_21 = arith.constant dense<0.000000e+00> : vector<16x32xf32>
    %55 = tpu.matmul %52, %54, %cst_21 {dimension_numbers = #tpu.dot_dimension_numbers<[1], [0], [0], [1], [0, 0, 1, 1], [], []>} : vector<16x32xf32>, vector<32x32xf32>, vector<16x32xf32> -> vector<16x32xf32>
    %56 = vector.broadcast %7 : vector<1x32xf32> to vector<16x32xf32>
    %57 = arith.addf %55, %56 : vector<16x32xf32>
    %58 = arith.addf %57, %3 : vector<16x32xf32>
    %cst_22 = arith.constant dense<0.000000e+00> : vector<16xf32>
    %59 = vector.multi_reduction <add>, %58, %cst_22 [1] : vector<16x32xf32> to vector<16xf32>
    %60 = vector.shape_cast %59 : vector<16xf32> to vector<16x1xf32>
    %cst_23 = arith.constant 3.200000e+01 : f32
    %61 = vector.broadcast %cst_23 : f32 to vector<16x1xf32>
    %62 = arith.divf %60, %61 : vector<16x1xf32>
    %63 = vector.broadcast %62 : vector<16x1xf32> to vector<16x32xf32>
    %64 = arith.subf %58, %63 : vector<16x32xf32>
    %65 = arith.mulf %64, %64 : vector<16x32xf32>
    %cst_24 = arith.constant dense<0.000000e+00> : vector<16xf32>
    %66 = vector.multi_reduction <add>, %65, %cst_24 [1] : vector<16x32xf32> to vector<16xf32>
    %67 = vector.shape_cast %66 : vector<16xf32> to vector<16x1xf32>
    %cst_25 = arith.constant 3.200000e+01 : f32
    %68 = vector.broadcast %cst_25 : f32 to vector<16x1xf32>
    %69 = arith.divf %67, %68 : vector<16x1xf32>
    %70 = vector.broadcast %62 : vector<16x1xf32> to vector<16x32xf32>
    %71 = arith.subf %58, %70 : vector<16x32xf32>
    %cst_26 = arith.constant 9.99999996E-13 : f32
    %72 = vector.broadcast %cst_26 : f32 to vector<16x1xf32>
    %73 = arith.addf %69, %72 : vector<16x1xf32>
    %74 = math.rsqrt %73 : vector<16x1xf32>
    %75 = vector.broadcast %74 : vector<16x1xf32> to vector<16x32xf32>
    %76 = arith.mulf %71, %75 : vector<16x32xf32>
    %77 = vector.broadcast %8 : vector<1x32xf32> to vector<16x32xf32>
    %78 = arith.mulf %76, %77 : vector<16x32xf32>
    %79 = vector.broadcast %9 : vector<1x32xf32> to vector<16x32xf32>
    %80 = arith.addf %78, %79 : vector<16x32xf32>
    %c0_27 = arith.constant 0 : index
    %c0_28 = arith.constant 0 : index
    %c0_29 = arith.constant 0 : index
    %81 = vector.load %arg7[%c0_27, %c0_28, %c0_29] : memref<1x32x64xf32, #tpu.memory_space<vmem>>, vector<1x32x64xf32>
    %82 = vector.shape_cast %81 : vector<1x32x64xf32> to vector<32x64xf32>
    %cst_30 = arith.constant dense<0.000000e+00> : vector<16x64xf32>
    %83 = tpu.matmul %80, %82, %cst_30 {dimension_numbers = #tpu.dot_dimension_numbers<[1], [0], [0], [1], [0, 0, 1, 1], [], []>} : vector<16x32xf32>, vector<32x64xf32>, vector<16x64xf32> -> vector<16x64xf32>
    %84 = vector.broadcast %10 : vector<1x64xf32> to vector<16x64xf32>
    %85 = arith.addf %83, %84 : vector<16x64xf32>
    %cst_31 = arith.constant 5.000000e-01 : f32
    %86 = vector.broadcast %cst_31 : f32 to vector<16x64xf32>
    %87 = arith.mulf %86, %85 : vector<16x64xf32>
    %cst_32 = arith.constant 4.471500e-02 : f32
    %88 = vector.broadcast %cst_32 : f32 to vector<16x64xf32>
    %89 = arith.mulf %88, %85 : vector<16x64xf32>
    %90 = arith.mulf %89, %85 : vector<16x64xf32>
    %91 = arith.mulf %90, %85 : vector<16x64xf32>
    %92 = arith.addf %85, %91 : vector<16x64xf32>
    %cst_33 = arith.constant 0.797884583 : f32
    %93 = vector.broadcast %cst_33 : f32 to vector<16x64xf32>
    %94 = arith.mulf %93, %92 : vector<16x64xf32>
    %95 = math.tanh %94 : vector<16x64xf32>
    %cst_34 = arith.constant 1.000000e+00 : f32
    %96 = vector.broadcast %cst_34 : f32 to vector<16x64xf32>
    %97 = arith.addf %96, %95 : vector<16x64xf32>
    %98 = arith.mulf %87, %97 : vector<16x64xf32>
    %c0_35 = arith.constant 0 : index
    %c0_36 = arith.constant 0 : index
    %c0_37 = arith.constant 0 : index
    %99 = vector.load %arg8[%c0_35, %c0_36, %c0_37] : memref<1x64x32xf32, #tpu.memory_space<vmem>>, vector<1x64x32xf32>
    %100 = vector.shape_cast %99 : vector<1x64x32xf32> to vector<64x32xf32>
    %cst_38 = arith.constant dense<0.000000e+00> : vector<16x32xf32>
    %101 = tpu.matmul %98, %100, %cst_38 {dimension_numbers = #tpu.dot_dimension_numbers<[1], [0], [0], [1], [0, 0, 1, 1], [], []>} : vector<16x64xf32>, vector<64x32xf32>, vector<16x32xf32> -> vector<16x32xf32>
    %102 = vector.broadcast %11 : vector<1x32xf32> to vector<16x32xf32>
    %103 = arith.addf %101, %102 : vector<16x32xf32>
    %104 = arith.addf %103, %80 : vector<16x32xf32>
    %cst_39 = arith.constant dense<0.000000e+00> : vector<16xf32>
    %105 = vector.multi_reduction <add>, %104, %cst_39 [1] : vector<16x32xf32> to vector<16xf32>
    %106 = vector.shape_cast %105 : vector<16xf32> to vector<16x1xf32>
    %cst_40 = arith.constant 3.200000e+01 : f32
    %107 = vector.broadcast %cst_40 : f32 to vector<16x1xf32>
    %108 = arith.divf %106, %107 : vector<16x1xf32>
    %109 = vector.broadcast %108 : vector<16x1xf32> to vector<16x32xf32>
    %110 = arith.subf %104, %109 : vector<16x32xf32>
    %111 = arith.mulf %110, %110 : vector<16x32xf32>
    %cst_41 = arith.constant dense<0.000000e+00> : vector<16xf32>
    %112 = vector.multi_reduction <add>, %111, %cst_41 [1] : vector<16x32xf32> to vector<16xf32>
    %113 = vector.shape_cast %112 : vector<16xf32> to vector<16x1xf32>
    %cst_42 = arith.constant 3.200000e+01 : f32
    %114 = vector.broadcast %cst_42 : f32 to vector<16x1xf32>
    %115 = arith.divf %113, %114 : vector<16x1xf32>
    %116 = vector.broadcast %108 : vector<16x1xf32> to vector<16x32xf32>
    %117 = arith.subf %104, %116 : vector<16x32xf32>
    %cst_43 = arith.constant 9.99999996E-13 : f32
    %118 = vector.broadcast %cst_43 : f32 to vector<16x1xf32>
    %119 = arith.addf %115, %118 : vector<16x1xf32>
    %120 = math.rsqrt %119 : vector<16x1xf32>
    %121 = vector.broadcast %120 : vector<16x1xf32> to vector<16x32xf32>
    %122 = arith.mulf %117, %121 : vector<16x32xf32>
    %123 = vector.broadcast %12 : vector<1x32xf32> to vector<16x32xf32>
    %124 = arith.mulf %122, %123 : vector<16x32xf32>
    %125 = vector.broadcast %13 : vector<1x32xf32> to vector<16x32xf32>
    %126 = arith.addf %124, %125 : vector<16x32xf32>
    %c0_44 = arith.constant 0 : index
    %c0_45 = arith.constant 0 : index
    %127 = vector.load %arg10[%c0_44, %c0_45] : memref<16x32xf32, #tpu.memory_space<vmem>>, vector<16x32xf32>
    tpu.vector_store %arg10[%c0_44, %c0_45], %126 {strides = array<i32>} : memref<16x32xf32, #tpu.memory_space<vmem>>, vector<16x32xf32>,
    return
  }
  func.func @transform_0(%arg0: i32) -> (i32, i32) {
    %c0_i32 = arith.constant 0 : i32
    %c0_i32_0 = arith.constant 0 : i32
    %c0_i32_1 = arith.constant 0 : i32
    return %c0_i32, %c0_i32_0 : i32, i32
  }
  func.func @transform_1(%arg0: i32) -> (i32, i32) {
    %c0_i32 = arith.constant 0 : i32
    %c0_i32_0 = arith.constant 0 : i32
    %c0_i32_1 = arith.constant 0 : i32
    return %c0_i32, %c0_i32_0 : i32, i32
  }
  func.func @transform_2(%arg0: i32) -> (i32, i32) {
    %c0_i32 = arith.constant 0 : i32
    %c0_i32_0 = arith.constant 0 : i32
    %c0_i32_1 = arith.constant 0 : i32
    return %c0_i32, %c0_i32_0 : i32, i32
  }
  func.func @transform_3(%arg0: i32) -> (i32, i32) {
    %c0_i32 = arith.constant 0 : i32
    %c0_i32_0 = arith.constant 0 : i32
    %c0_i32_1 = arith.constant 0 : i32
    return %c0_i32, %c0_i32_0 : i32, i32
  }
  func.func @transform_4(%arg0: i32) -> (i32, i32, i32) {
    %c0_i32 = arith.constant 0 : i32
    %c0_i32_0 = arith.constant 0 : i32
    %c0_i32_1 = arith.constant 0 : i32
    return %arg0, %c0_i32, %c0_i32_0 : i32, i32, i32
  }
  func.func @transform_5(%arg0: i32) -> (i32, i32, i32) {
    %c0_i32 = arith.constant 0 : i32
    %c0_i32_0 = arith.constant 0 : i32
    %c0_i32_1 = arith.constant 0 : i32
    return %arg0, %c0_i32, %c0_i32_0 : i32, i32, i32
  }
  func.func @transform_6(%arg0: i32) -> (i32, i32, i32) {
    %c0_i32 = arith.constant 0 : i32
    %c0_i32_0 = arith.constant 0 : i32
    %c0_i32_1 = arith.constant 0 : i32
    return %arg0, %c0_i32, %c0_i32_0 : i32, i32, i32
  }
  func.func @transform_7(%arg0: i32) -> (i32, i32, i32) {
    %c0_i32 = arith.constant 0 : i32
    %c0_i32_0 = arith.constant 0 : i32
    %c0_i32_1 = arith.constant 0 : i32
    return %arg0, %c0_i32, %c0_i32_0 : i32, i32, i32
  }
  func.func @transform_8(%arg0: i32) -> (i32, i32, i32) {
    %c0_i32 = arith.constant 0 : i32
    %c0_i32_0 = arith.constant 0 : i32
    %c0_i32_1 = arith.constant 0 : i32
    return %arg0, %c0_i32, %c0_i32_0 : i32, i32, i32
  }
  func.func @transform_9(%arg0: i32) -> (i32, i32) {
    %c0_i32 = arith.constant 0 : i32
    %c0_i32_0 = arith.constant 0 : i32
    %c0_i32_1 = arith.constant 0 : i32
    return %c0_i32, %c0_i32_0 : i32, i32
  }
}

</mosaic_0001>

<bundles_post_ra>
// kernel: custom_bert_forward.1
= control target key start
LH: loop header
LB: loop body
LE: loop exit
PB: predicated region body
PF: predicated region fallthrough
CT: control target
= control target key end

     0   :  { %s1672_s0 = inlined_call_operand.vmem [shape: f32[16,32], index: 0, kind: input, shape index: {}]   ;;  %s1673_s1 = inlined_call_operand.vmem [shape: f32[16,16], index: 1, kind: input, shape index: {}]   ;;  %s1674_s2 = inlined_call_operand.vmem [shape: f32[1,32], index: 2, kind: input, shape index: {}]   ;;  %s1675_s3 = inlined_call_operand.vmem [shape: f32[1,32], index: 3, kind: input, shape index: {}]   ;;  %s1676_s4 = inlined_call_operand.hbm [shape: f32[2,32,96], index: 4, kind: input, shape index: {}]   ;;  %s1677_s5 = inlined_call_operand.hbm [shape: f32[2,32,32], index: 5, kind: input, shape index: {}]   ;;  %s1678_s6 = inlined_call_operand.vmem [shape: f32[2,32,64], index: 6, kind: input, shape index: {}]   ;;  %s1679_s7 = inlined_call_operand.vmem [shape: f32[2,64,32], index: 7, kind: input, shape index: {}]   ;;  %s1680_s8 = inlined_call_operand.vmem [shape: f32[2,8,96], index: 8, kind: input, shape index: {}]   ;;  %s1681_s9 = inlined_call_operand.vmem [shape: f32[16,32], index: 9, kind: output, shape index: {}]  }
   0x1   :  { %1687 = sst [smem:[#allocation11_spill]] %s1676_s4 }
   0x2   :  { %14 = vsyncpa [#allocation3], 0 }
   0x3   :  { %16 = vsyncpa [#allocation3 + $0x1], 0 }
   0x4   :  { %17 = vsyncpa [#allocation5], 0 }
   0x5   :  { %19 = vsyncpa [#allocation5 + $0x1], 0  ;;  %s1394_s30 = smov 0   ;;  %s1396_s10 = smov 0  }
   0x6   :  { %s1398_s11 = smov 0   ;;  %s1400_s12 = smov 0  }
   0x7 LB: > { %1688 = sst [smem:[#allocation8_spill]] %s1328_s11  ;;  %s1413_s13 = sadd.s32 4294967295, %s1332_s12   ;;  %s1332_s12 = sphi %s1400_s12, %s1698_s12   ;;  %s1328_s11 = sphi %s1398_s11, %s1700_s11   ;;  %s1324_s10 = sphi %s1396_s10, %s1702_s10   ;;  %s1320_s30 = sphi %s1394_s30, %s1701_s30  }
   0x8   : > { %s1416_s14 = sadd.s32 1, %s1332_s12   ;;  %s116_s16 = sadd.s32 1, %s1328_s11 }
   0x9   : > { %1689 = sst [smem:[#allocation9_spill]] %s1416_s14  ;;  %s113_s15 = ssub.s32 %s1332_s12, %s1416_s14 }
   0xa   : > { %p114_p0 = scmp.eq.s32.totalorder %s113_s15, 0  ;;  %p123_p1 = scmp.ne.s32.totalorder %s1328_s11, %s1324_s10 }
   0xb   : > { %p124_p2 = scmp.eq.s32.totalorder %s1332_s12, 0  ;;  %p129_p3 = scmp.ne.s32.totalorder %s1324_s10, %s1320_s30 }
   0xc   : > { %s1426_s17 = scalar_select %p114_p0, %s1328_s11, %s116_s16  }
   0xd   : > { %p1428_p4 = por %p124_p2, %p123_p1  ;;  %p130_p5 = scmp.eq.s32.totalorder %s1413_s13, 0 }
   0xe   : > { %1690 = sst [smem:[#allocation10_spill]] %s1426_s17  ;;  %p1143_p6 = scmp.lt.s32.totalorder %s1332_s12, 2 }
   0xf   : > { %p1434_p7 = por %p130_p5, %p129_p3  ;;  %s1439_s20 = sand.u32 1, %s1328_s11  }
  0x10   : > { %s1682_s21 = sshll.u32 %s1439_s20, 5  ;;  %s1683_s22 = sshll.u32 %s1332_s12, 5 }
  0x11   : > { %s1693_s4 = sld [smem:[#allocation11_spill]]  ;;  %s294_s26 = scalar_lea.vmem [#allocation2], %s1682_s21 }
  0x12   : > { %s302_s27 = sshll.u32 %s294_s26, 4  ;;  %p1452_p8 = pnand %p1143_p6, %p1428_p4  ;;  %s303_s27 = int_to_ptr.vmem [resolvable:$true] %s302_s27 }
  0x13   : > { %p1097_p9 = scmp.ge.s32.totalorder %s1332_s12, 1  ;;  %s291_s30 = scalar_lea.sflag [#allocation3], %s1439_s20 }
  0x14   : > { %p1238_p11 = pneg %p1452_p8 }
  0x17   : > { %s299_s25 = scalar_lea.hbm %s1693_s4, %s1683_s22  ;;  %s1241_s24 = scalar_lea.hbm %s1693_s4, 64 }
  0x18   : > { %s300_s28 = sshll.u32 %s299_s25, 4  ;;  %s301_s28 = int_to_ptr.hbm [resolvable:$true] %s300_s28 }
  0x19   : > { %s1234_s15 = sshra.s32 %s301_s28, 4  ;;  %s1235_s15 = int_to_ptr.hbm [resolvable:$true] %s1234_s15 }
  0x1a   : > { %s1236_s16 = scalar_lea.hbm %s1235_s15, 32  ;;  %p1242_p0 = scmp.lt.s32.totalorder %s1235_s15, %s1693_s4 }
  0x1b   : > { %p1237_p10 = scmp.ne.s32.totalorder %s1235_s15, %s1236_s16  ;;  %p1243_p1 = scmp.lt.s32.totalorder %s1241_s24, %s1236_s16 }
  0x1d   : > { %p1239_p12 = pnand %p1238_p11, %p1237_p10  ;;  %p1244_p2 = por %p1243_p1, %p1242_p0 }
  0x1f   : > { %p1240_p13 = pneg %p1239_p12 }
  0x21   : > { %p1245_p3 = pnand %p1244_p2, %p1240_p13 }
  0x23   : > { %1248 = shalt.err (!%p1245_p3)
}
  0x24   : > { %s1334_s21 = smov 128   ;;  %s1335_s22 = smov 8  }
  0x25   : > { %1139 = dma.hbm_to_vmem [thread:$0]  (!%p1452_p8), %s301_s28, 512, %s303_s27, %s291_s30, %s1334_s21, %s1334_s21, %s1335_s22  }
  0x26   : > { %p355_p4 = scmp.lt.s32.totalorder %s1332_s12, 3  ;;  %s1695_s23 = sshll.u32 %s1332_s12, 5 }
  0x27   : > { %s321_s15 = scalar_lea.hbm %s1677_s5, %s1695_s23  ;;  %s1697_s26 = sshll.u32 %s1439_s20, 5 }
  0x28   : > { %p1479_p5 = pnand %p1097_p9, %p355_p4  ;;  %s322_s24 = sshll.u32 %s321_s15, 4  ;;  %s323_s24 = int_to_ptr.hbm [resolvable:$true] %s322_s24 }
  0x29   : > { %s316_s4 = scalar_lea.vmem [#allocation4], %s1697_s26  ;;  %s313_s11 = scalar_lea.sflag [#allocation5], %s1439_s20 }
  0x2a   : > { %s324_s17 = sshll.u32 %s316_s4, 4  ;;  %s1264_s14 = sshra.s32 %s323_s24, 4  ;;  %s325_s17 = int_to_ptr.vmem [resolvable:$true] %s324_s17  ;;  %s1265_s14 = int_to_ptr.hbm [resolvable:$true] %s1264_s14 }
  0x2b   : > { %s1266_s27 = scalar_lea.hbm %s1265_s14, 32  ;;  %s1271_s30 = scalar_lea.hbm %s1677_s5, 64 }
  0x2c   : > { %p1267_p6 = scmp.ne.s32.totalorder %s1265_s14, %s1266_s27  ;;  %p1272_p9 = scmp.lt.s32.totalorder %s1265_s14, %s1677_s5 }
  0x2d   : > { %p1273_p13 = scmp.lt.s32.totalorder %s1271_s30, %s1266_s27 }
  0x2e   : > { %p1269_p10 = pnand %p1267_p6, %p1238_p11 }
  0x2f   : > { %p1274_p0 = por %p1273_p13, %p1272_p9 }
  0x30   : > { %p1270_p12 = pneg %p1269_p10 }
  0x32   : > { %p1275_p1 = pnand %p1274_p0, %p1270_p12 }
  0x34   : > { %1278 = shalt.err (!%p1275_p1)
}
  0x35   : > { %1142 = dma.hbm_to_vmem [thread:$0]  (!%p1452_p8), %s323_s24, 512, %s325_s17, %s313_s11, %s1334_s21, %s1334_s21, %s1335_s22  }
  0x36   : > { %359 = sbr.rel (%p1479_p5) target bundleno = 2224 (0x8b0), region = 56  ;;  %s361_s4 = sand.u32 (!%p1479_p5), 1, %s1324_s10  }
  0x37   : > { %s1098_s20 = sshll.u32 (!%p1479_p5), %s361_s4, 5  ;;  %s362_s25 = scalar_lea.sflag (!%p1479_p5), [#allocation3], %s361_s4 }
  0x38   : > { %s1500_s15 = scalar_lea.vmem (!%p1479_p5), [#allocation2], %s1098_s20 }
  0x3b   : > { %1311 = dma.done.wait (%p1434_p7), %s362_s25, 512  }
  0x3c   : > { %1313 = vsyncadd (%p1434_p7), %s362_s25, 4294966784  ;;  %s372_s14 = scalar_lea.sflag [#allocation5], %s361_s4  ;;  %s1506_s26 = scalar_lea.vmem [#allocation4], %s1098_s20 }
  0x3d   : > { %1315 = dma.done.wait (%p1434_p7), %s372_s14, 512  }
  0x3e   : > { %1317 = vsyncadd (%p1434_p7), %s372_s14, 4294966784  ;;  %p425_p8 = scmp.lt.s32.totalorder %s1413_s13, 1  ;;  %p1105_p7 = scmp.ne.s32.totalorder %s1413_s13, 0 }
  0x40   : > { %s426_s11 = scalar_select %p425_p8, %s1413_s13, 1 }
  0x41   : > { %442 = sbr.rel (%p1105_p7) target bundleno = 348 (0x15c), region = 68 }
  0x42   : > { %s1130_s17 = sshll.u32 %s426_s11, 5  ;;  %s1131_s21 = sshll.u32 %s426_s11, 6 }
  0x43   : > { %s1517_s16 = scalar_lea.vmem %s1678_s6, %s1130_s17  ;;  %s1522_s12 = scalar_lea.vmem %s1679_s7, %s1131_s21 }
  0x44   : > { %s1104_s28 = sshll.u32 %s426_s11, 3 }
  0x45   : > { %s1527_s23 = scalar_lea.vmem %s1680_s8, %s1104_s28 }
  0x46   : > { %v443_v0 = vld [vmem:[%s1672_s0] sm:$0xff]  ;;  %vm447_vm0 = vcmask 261120   ;;  %v444_v2 = vld [vmem:[%s1672_s0 + $0x8] sm:$0xff]  ;;  %v1336_v4 = vmov 32.0  }
  0x47   : > { %v448_v1 = vsel %vm447_vm0, %v443_v0, 0.0  ;;  %v451_v3 = vsel %vm447_vm0, %v444_v2, 0.0  ;;  %1188 = vrcp.f32 %v1336_v4  ;;  %v1186_v35 = vld [vmem:[%s1674_s2] ss:$0 sm:$0xff] }
  0x48   : > { %449 = vadd.xlane.f32.xlu0 %v448_v1  ;;  %v1187_v38 = vld [vmem:[%s1675_s3] ss:$0 sm:$0xff] }
  0x4d   : > { %v1189_v5 = vpop.eup %1188 }
  0x4e   : > { %v455_v6 = vmul.f32 32.0, %v1189_v5  ;;  %vm459_vm1 = vweird.f32 %v1189_v5 }
  0x50   : > { %452 = vadd.xlane.f32.xlu0 %v451_v3  ;;  %v456_v7 = vsub.f32 1.0, %v455_v6 }
  0x52   : > { %v457_v8 = vmul.f32 %v1189_v5, %v456_v7 }
  0x54   : > { %v458_v9 = vadd.f32 %v1189_v5, %v457_v8 }
  0x56   : > { %v460_v10 = vsel %vm459_vm1, %v1189_v5, %v458_v9 }
  0xbb   : > { %v450_v11 = vpop.xlane.xlu0 %449 }
  0xbc   : > { %v461_v12 = vmul.f32 %v460_v10, %v450_v11 }
  0xbe   : > { %v463_v13 = vsub.f32 %v443_v0, %v461_v12 }
  0xc0   : > { %v465_v14 = vmul.f32 %v463_v13, %v463_v13 }
  0xc2   : > { %v467_v15 = vsel %vm447_vm0, %v465_v14, 0.0 }
  0xc3   : > { %468 = vadd.xlane.f32.xlu1 %v467_v15  ;;  %v453_v16 = vpop.xlane.xlu0 %452 }
  0xc4   : > { %v462_v17 = vmul.f32 %v460_v10, %v453_v16 }
  0xc6   : > { %v464_v18 = vsub.f32 %v444_v2, %v462_v17 }
  0xc8   : > { %v466_v19 = vmul.f32 %v464_v18, %v464_v18 }
  0xca   : > { %v470_v20 = vsel %vm447_vm0, %v466_v19, 0.0 }
  0xcb   : > { %471 = vadd.xlane.f32.xlu1 %v470_v20 }
 0x136   : > { %v469_v21 = vpop.xlane.xlu1 %468 }
 0x137   : > { %v473_v22 = vmul.f32 %v469_v21, %v460_v10 }
 0x139   : > { %v475_v23 = vadd.f32 1e-12, %v473_v22 }
 0x13b   : > { %1190 = vrsqrt.f32 %v475_v23  ;;  %vm483_vm3 = vweird.f32 %v475_v23 }
 0x13e   : > { %v472_v24 = vpop.xlane.xlu1 %471 }
 0x13f   : > { %v474_v25 = vmul.f32 %v472_v24, %v460_v10 }
 0x141   : > { %v1191_v26 = vpop.eup %1190  ;;  %v476_v27 = vadd.f32 1e-12, %v474_v25 }
 0x142   : > { %v478_v28 = vmul.f32 %v1191_v26, %v475_v23  ;;  %vm484_vm2 = vweird.f32 %v1191_v26 }
 0x143   : > { %1192 = vrsqrt.f32 %v476_v27  ;;  %vm485_vm4 = vmor %vm483_vm3, %vm484_vm2  ;;  %vm493_vm6 = vweird.f32 %v476_v27 }
 0x144   : > { %v479_v29 = vmul.f32 %v1191_v26, %v478_v28 }
 0x146   : > { %v480_v30 = vmul.f32 0.5, %v479_v29 }
 0x148   : > { %v481_v31 = vsub.f32 1.5, %v480_v30 }
 0x149   : > { %v1193_v32 = vpop.eup %1192 }
 0x14a   : > { %v482_v33 = vmul.f32 %v1191_v26, %v481_v31  ;;  %v488_v34 = vmul.f32 %v1193_v32, %v476_v27  ;;  %vm494_vm5 = vweird.f32 %v1193_v32 }
 0x14b   : > { %vm495_vm7 = vmor %vm493_vm6, %vm494_vm5 }
 0x14c   : > { %v486_v36 = vsel %vm485_vm4, %v1191_v26, %v482_v33  ;;  %v489_v37 = vmul.f32 %v1193_v32, %v488_v34 }
 0x14d   : > { %v497_v39 = vmul.f32 %v486_v36, %v463_v13 }
 0x14e   : > { %v490_v40 = vmul.f32 0.5, %v489_v37 }
 0x14f   : > { %v502_v41 = vmul.f32 %v1186_v35, %v497_v39 }
 0x150   : > { %v491_v42 = vsub.f32 1.5, %v490_v40 }
 0x151   : > { %v507_v43 = vadd.f32 %v1187_v38, %v502_v41 }
 0x152   : > { %v492_v44 = vmul.f32 %v1193_v32, %v491_v42 }
 0x153   : > { %509 = vst.msk [vmem:[%s1681_s9] sm:$0xff] %vm447_vm0, %v507_v43 }
 0x154   : > { %v496_v45 = vsel %vm495_vm7, %v1193_v32, %v492_v44 }
 0x155   : > { %v498_v46 = vmul.f32 %v496_v45, %v464_v18 }
 0x157   : > { %v503_v47 = vmul.f32 %v1186_v35, %v498_v46 }
 0x159   : > { %v508_v48 = vadd.f32 %v1187_v38, %v503_v47 }
 0x15b   : > { %510 = vst.msk [vmem:[%s1681_s9 + $0x8] sm:$0xff] %vm447_vm0, %v508_v48 }
 0x15c PF: > { %v517_v49 = vld [vmem:[%s1500_s15 + $0x18] sm:$0xff]  ;;  %v516_v50 = vld [vmem:[%s1500_s15 + $0x10] sm:$0xff]  ;;  %v515_v51 = vld [vmem:[%s1500_s15 + $0x8] sm:$0xff]  ;;  %vm519_vm8 = vcmask 261120   ;;  %s1338_s18 = smov 80   ;;  %s1339_s4 = smov 96  }
 0x15d   : > { %538 = vmatpush.msra.mxu0 %v517_v49  ;;  %v514_v52 = vld [vmem:[%s1500_s15] sm:$0xff]  ;;  %s1337_s15 = smov 112   ;;  %vm557_vm9 = vcmask 130048   ;;  %v550_v8 = vld [vmem:[%s1673_s1 + $0x8] sm:$0xff]  ;;  %s1340_s14 = smov 64   ;;  %vm906_vm1 = vcmask 523264  }
 0x15e   : > { %v1561_v53 = vld [vmem:[%s1681_s9] sm:$0xff]  ;;  %s1341_s11 = smov 48   ;;  %s1342_s17 = smov 16  }
 0x15f   : > { %539 = vmatpush.msra.mxu0 %v516_v50  ;;  %v1573_v55 = vld [vmem:[%s1527_s23] sm:$0xff] }
 0x160   : > { %v518_v56 = vperm.slane %v1573_v55, 0  ;;  %v549_v3 = vld [vmem:[%s1673_s1] sm:$0xff] }
 0x161   : > { %540 = vmatpush.msra.mxu0 %v515_v51 }
 0x162   : > { %v1568_v54 = vld [vmem:[%s1681_s9 + $0x8] sm:$0xff] }
 0x163   : > { %541 = vmatpush.msra.mxu0 %v514_v52 }
 0x164   : > { %1106 = vmatmul.msk.f32.vlgmr.msra.gmra.mxu0 %vm519_vm8, %v1561_v53 }
 0x16c   : > { %1107 = vmatmul.msk.f32.gmra.mxu0 %vm519_vm8, %v1568_v54 }
 0x1e1   : > { %v543_v57 = vpop.f32.mrf.mxu0 }
 0x1e2   : > { %v544_v58 = vadd.f32 %v543_v57, %v518_v56 }
 0x1e4   : > { %646 = vrot.lane.b32.xlu2 %v544_v58, %s1337_s15 }
 0x1e9   : > { %v546_v59 = vpop.f32.mrf.mxu0 }
 0x1ea   : > { %v547_v60 = vadd.f32 %v546_v59, %v518_v56  ;;  %v755_v59 = vld [vmem:[%s1506_s26 + $0x18] sm:$0xff] }
 0x1eb   : > { %775 = vmatpush.msrb.mxu0 %v755_v59 }
 0x1ec   : > { %652 = vrot.lane.b32.xlu1 %v547_v60, %s1338_s18  ;;  %555 = vrot.lane.b32.xlu0 %v547_v60, %s1339_s4  ;;  %v1194_v17 = vpack.i.bf16 %v544_v58, %v547_v60 }
 0x1ed   : > { %648 = vrot.lane.b32.xlu2 %v547_v60, %s1337_s15 }
 0x1f4   : > { %650 = vrot.lane.b32.xlu1 %v544_v58, %s1338_s18  ;;  %553 = vrot.lane.b32.xlu0 %v544_v58, %s1339_s4 }
 0x23e   : > { %v647_v1 = vpop.permute.xlu2 %646 }
 0x247   : > { %v649_v2 = vpop.permute.xlu2 %648 }
 0x25e   : > { %v653_v61 = vpop.permute.xlu1 %652  ;;  %v556_v62 = vpop.permute.xlu0 %555 }
 0x25f   : > { %1108 = vmatpush.xpose.msk.msra.mxu1 %vm557_vm9, %v556_v62  ;;  %1114 = vmatpush.xpose.msk.msra.mxu3 %vm557_vm9, %v653_v61  ;;  %v753_v61 = vld [vmem:[%s1506_s26 + $0x8] sm:$0xff] }
 0x266   : > { %v651_v63 = vpop.permute.xlu1 %650  ;;  %v554_v0 = vpop.permute.xlu0 %553 }
 0x267   : > { %1109 = vmatpush.xpose.msk.msra.mxu1 %vm557_vm9, %v554_v0  ;;  %1115 = vmatpush.xpose.msk.msra.mxu3 %vm557_vm9, %v651_v63 }
 0x26a   : > { %1110 = vmatmul.msk.f32.vlgmr.msra.gmra.mxu1 %vm557_vm9, %v544_v58  ;;  %1116 = vmatmul.msk.f32.vlgmr.msra.gmra.mxu3 %vm557_vm9, %v647_v1 }
 0x272   : > { %1111 = vmatmul.msk.f32.gmra.mxu1 %vm557_vm9, %v547_v60  ;;  %1117 = vmatmul.msk.f32.gmra.mxu3 %vm557_vm9, %v649_v2  ;;  %v754_v60 = vld [vmem:[%s1506_s26 + $0x10] sm:$0xff]  ;;  %v752_v2 = vld [vmem:[%s1506_s26] sm:$0xff] }
 0x273   : > { %776 = vmatpush.msrb.mxu0 %v754_v60 }
 0x275   : > { %777 = vmatpush.msrb.mxu0 %v753_v61 }
 0x277   : > { %778 = vmatpush.msrb.mxu0 %v752_v2  ;;  %v904_v2 = vld [vmem:[%s1522_s12 + $0x38] sm:$0xff] }
 0x278   : > { %921 = vmatpush.msrb.mxu3 %v904_v2 }
 0x2e7   : > { %v583_v4 = vpop.f32.mrf.mxu1 }
 0x2e8   : > { %v584_v5 = vadd.f32 %v583_v4, %v549_v3 }
 0x2ea   : > { %v589_v6 = vsel %vm557_vm9, %v584_v5, -inf }
 0x2eb   : > { %590 = vmax.xlane.f32.xlu0 %v589_v6 }
 0x2ed   : > { %v679_v7 = vpop.f32.mrf.mxu3 }
 0x2ee   : > { %v680_v9 = vadd.f32 %v679_v7, %v549_v3  ;;  %v756_v7 = vperm.slane %v1573_v55, 1 }
 0x2ef   : > { %v586_v10 = vpop.f32.mrf.mxu1 }
 0x2f0   : > { %v587_v11 = vadd.f32 %v586_v10, %v550_v8  ;;  %v685_v12 = vsel %vm557_vm9, %v680_v9, -inf }
 0x2f1   : > { %686 = vmax.xlane.f32.xlu2 %v685_v12 }
 0x2f2   : > { %v592_v13 = vsel %vm557_vm9, %v587_v11, -inf }
 0x2f3   : > { %593 = vmax.xlane.f32.xlu1 %v592_v13 }
 0x2f5   : > { %v682_v14 = vpop.f32.mrf.mxu3 }
 0x2f6   : > { %v683_v15 = vadd.f32 %v682_v14, %v550_v8 }
 0x2f8   : > { %v688_v16 = vsel %vm557_vm9, %v683_v15, -inf }
 0x2f9   : > { %689 = vmax.xlane.f32.xlu2 %v688_v16  ;;  %v1343_v16 = vmov 32.0  }
 0x30c   : > { %1195 = vrot.lane.b32.xlu1 %v1194_v17, %s1340_s14 }
 0x35e   : > { %v591_v18 = vpop.xlane.xlu0 %590 }
 0x35f   : > { %v595_v19 = vsub.f32 %v584_v5, %v591_v18 }
 0x361   : > { %v597_v20 = vmul.f32 1.442695, %v595_v19 }
 0x363   : > { %1204 = vpow2.f32 %v597_v20 }
 0x364   : > { %v687_v21 = vpop.xlane.xlu2 %686 }
 0x365   : > { %v691_v22 = vsub.f32 %v680_v9, %v687_v21 }
 0x366   : > { %v594_v23 = vpop.xlane.xlu1 %593 }
 0x367   : > { %v693_v24 = vmul.f32 1.442695, %v691_v22  ;;  %v596_v25 = vsub.f32 %v587_v11, %v594_v23 }
 0x369   : > { %v1205_v26 = vpop.eup %1204  ;;  %1206 = vpow2.f32 %v693_v24  ;;  %v599_v27 = vmul.f32 1.442695, %v596_v25 }
 0x36a   : > { %v601_v28 = vsel %vm557_vm9, %v1205_v26, 0.0 }
 0x36b   : > { %1208 = vpow2.f32 %v599_v27  ;;  %602 = vadd.xlane.f32.xlu0 %v601_v28 }
 0x36c   : > { %v690_v29 = vpop.xlane.xlu2 %689 }
 0x36d   : > { %v692_v30 = vsub.f32 %v683_v15, %v690_v29 }
 0x36f   : > { %v1207_v31 = vpop.eup %1206  ;;  %v695_v32 = vmul.f32 1.442695, %v692_v30 }
 0x370   : > { %v697_v35 = vsel %vm557_vm9, %v1207_v31, 0.0 }
 0x371   : > { %v1209_v33 = vpop.eup %1208  ;;  %1210 = vpow2.f32 %v695_v32  ;;  %v847_v32 = vld [vmem:[%s1517_s16 + $0x10] sm:$0xff] }
 0x372   : > { %v604_v34 = vsel %vm557_vm9, %v1209_v33, 0.0 }
 0x373   : > { %605 = vadd.xlane.f32.xlu2 %v604_v34  ;;  %698 = vadd.xlane.f32.xlu0 %v697_v35  ;;  %v845_v34 = vld [vmem:[%s1517_s16] sm:$0xff] }
 0x377   : > { %v1211_v36 = vpop.eup %1210 }
 0x378   : > { %v700_v37 = vsel %vm557_vm9, %v1211_v36, 0.0 }
 0x37b   : > { %701 = vadd.xlane.f32.xlu0 %v700_v37 }
 0x37e   : > { %v1196_v38 = vpop.permute.xlu1 %1195 }
 0x37f   : > { %v1197_v39 = vunpack.i.l.bf16 %v1196_v38  ;;  %v1198_v40 = vunpack.i.h.bf16 %v1196_v38 }
 0x381   : > { %637 = vmatpush.msra.mxu2 %v1197_v39 }
 0x383   : > { %638 = vmatpush.msra.mxu2 %v1198_v40 }
 0x38b   : > { %1200 = vrot.lane.b32.xlu2 %v1194_v17, %s1341_s11 }
 0x3de   : > { %v603_v41 = vpop.xlane.xlu0 %602 }
 0x3df   : > { %1212 = vrcp.f32 %v603_v41 }
 0x3e5   : > { %v1213_v42 = vpop.eup %1212 }
 0x3e6   : > { %v606_v43 = vpop.xlane.xlu2 %605  ;;  %v609_v44 = vmul.f32 %v1213_v42, %v1205_v26  ;;  %v699_v45 = vpop.xlane.xlu0 %698 }
 0x3e7   : > { %1214 = vrcp.f32 %v606_v43 }
 0x3e8   : > { %1112 = vmatmul.msk.f32.vlgmr.msra.gmra.mxu2 %vm557_vm9, %v609_v44  ;;  %1216 = vrcp.f32 %v699_v45 }
 0x3ed   : > { %v1215_v46 = vpop.eup %1214 }
 0x3ee   : > { %v1201_v47 = vpop.permute.xlu2 %1200  ;;  %v610_v48 = vmul.f32 %v1215_v46, %v1209_v33  ;;  %v702_v51 = vpop.xlane.xlu0 %701  ;;  %v846_v33 = vld [vmem:[%s1517_s16 + $0x8] sm:$0xff] }
 0x3ef   : > { %v1202_v49 = vunpack.i.l.bf16 %v1201_v47  ;;  %v1203_v50 = vunpack.i.h.bf16 %v1201_v47  ;;  %v1217_v52 = vpop.eup %1216  ;;  %1218 = vrcp.f32 %v702_v51 }
 0x3f0   : > { %1113 = vmatmul.msk.f32.gmra.mxu2 %vm557_vm9, %v610_v48  ;;  %v705_v56 = vmul.f32 %v1217_v52, %v1207_v31  ;;  %1220 = vrcp.f32 %v1343_v16  ;;  %v848_v31 = vld [vmem:[%s1517_s16 + $0x18] sm:$0xff] }
 0x3f1   : > { %733 = vmatpush.msrb.mxu2 %v1202_v49  ;;  %868 = vmatpush.msrb.mxu1 %v848_v31  ;;  %v839_v49 = vperm.slane %v1573_v55, 2 }
 0x3f3   : > { %734 = vmatpush.msrb.mxu2 %v1203_v50  ;;  %869 = vmatpush.msrb.mxu1 %v847_v32  ;;  %v905_v32 = vperm.slane %v1573_v55, 5 }
 0x3f5   : > { %v1219_v57 = vpop.eup %1218  ;;  %870 = vmatpush.msrb.mxu1 %v846_v33 }
 0x3f6   : > { %v706_v58 = vmul.f32 %v1219_v57, %v1211_v36  ;;  %v1221_v17 = vpop.eup %1220 }
 0x3f7   : > { %v795_v18 = vmul.f32 32.0, %v1221_v17  ;;  %vm799_vm10 = vweird.f32 %v1221_v17  ;;  %871 = vmatpush.msrb.mxu1 %v845_v34 }
 0x3f8   : > { %1118 = vmatmul.msk.f32.vlgmr.msrb.gmra.mxu2 %vm557_vm9, %v705_v56  ;;  %v842_v56 = vperm.slane %v1573_v55, 3 }
 0x3f9   : > { %v796_v19 = vsub.f32 1.0, %v795_v18 }
 0x3fb   : > { %v797_v20 = vmul.f32 %v1221_v17, %v796_v19 }
 0x3fd   : > { %v798_v21 = vadd.f32 %v1221_v17, %v797_v20 }
 0x400   : > { %1119 = vmatmul.msk.f32.gmra.mxu2 %vm557_vm9, %v706_v58 }
 0x46b   : > { %v640_v62 = vpop.f32.mrf.mxu2 }
 0x473   : > { %v643_v63 = vpop.f32.mrf.mxu2 }
 0x47b   : > { %v736_v0 = vpop.f32.mrf.mxu2 }
 0x47c   : > { %744 = vrot.lane.b32.xlu0 %v736_v0, %s1342_s17 }
 0x483   : > { %v739_v1 = vpop.f32.mrf.mxu2 }
 0x484   : > { %746 = vrot.lane.b32.xlu1 %v739_v1, %s1342_s17 }
 0x4ee   : > { %v745_v3 = vpop.permute.xlu0 %744 }
 0x4ef   : > { %v750_v4 = vsel %vm557_vm9, %v640_v62, %v745_v3  ;;  %v903_v3 = vld [vmem:[%s1522_s12 + $0x30] sm:$0xff] }
 0x4f0   : > { %1120 = vmatmul.msk.f32.vlgmr.msrb.gmra.mxu0 %vm519_vm8, %v750_v4  ;;  %v902_v4 = vld [vmem:[%s1522_s12 + $0x28] sm:$0xff]  ;;  %922 = vmatpush.msrb.mxu3 %v903_v3 }
 0x4f2   : > { %923 = vmatpush.msrb.mxu3 %v902_v4  ;;  %v982_v4 = vperm.slane %v1573_v55, 6 }
 0x4f6   : > { %v747_v5 = vpop.permute.xlu1 %746 }
 0x4f7   : > { %v751_v6 = vsel %vm557_vm9, %v643_v63, %v747_v5  ;;  %v901_v5 = vld [vmem:[%s1522_s12 + $0x20] sm:$0xff] }
 0x4f8   : > { %1121 = vmatmul.msk.f32.gmra.mxu0 %vm519_vm8, %v751_v6  ;;  %v900_v6 = vld [vmem:[%s1522_s12 + $0x18] sm:$0xff]  ;;  %924 = vmatpush.msrb.mxu3 %v901_v5 }
 0x4fa   : > { %925 = vmatpush.msrb.mxu3 %v900_v6 }
 0x56d   : > { %v780_v8 = vpop.f32.mrf.mxu0 }
 0x56e   : > { %v781_v9 = vadd.f32 %v780_v8, %v756_v7  ;;  %v898_v8 = vld [vmem:[%s1522_s12 + $0x8] sm:$0xff] }
 0x570   : > { %v786_v10 = vadd.f32 %v781_v9, %v1561_v53  ;;  %v1615_v53 = vsel %vm799_vm10, %v1221_v17, %v798_v21  ;;  %v897_v9 = vld [vmem:[%s1522_s12] sm:$0xff] }
 0x572   : > { %v788_v11 = vsel %vm519_vm8, %v786_v10, 0.0 }
 0x573   : > { %789 = vadd.xlane.f32.xlu1 %v788_v11 }
 0x575   : > { %v783_v12 = vpop.f32.mrf.mxu0 }
 0x576   : > { %v784_v13 = vadd.f32 %v783_v12, %v756_v7  ;;  %v899_v7 = vld [vmem:[%s1522_s12 + $0x10] sm:$0xff] }
 0x577   : > { %926 = vmatpush.msrb.mxu3 %v899_v7  ;;  %v985_v7 = vperm.slane %v1573_v55, 7 }
 0x578   : > { %v787_v14 = vadd.f32 %v784_v13, %v1568_v54 }
 0x579   : > { %927 = vmatpush.msrb.mxu3 %v898_v8 }
 0x57a   : > { %v791_v15 = vsel %vm519_vm8, %v787_v14, 0.0 }
 0x57b   : > { %792 = vadd.xlane.f32.xlu2 %v791_v15  ;;  %928 = vmatpush.msrb.mxu3 %v897_v9 }
 0x5e6   : > { %v790_v22 = vpop.xlane.xlu1 %789 }
 0x5e7   : > { %v801_v23 = vmul.f32 %v1615_v53, %v790_v22 }
 0x5e9   : > { %v803_v54 = vsub.f32 %v786_v10, %v801_v23  ;;  %v849_v10 = vperm.slane %v1573_v55, 4 }
 0x5eb   : > { %v805_v24 = vmul.f32 %v803_v54, %v803_v54 }
 0x5ed   : > { %v807_v25 = vsel %vm519_vm8, %v805_v24, 0.0 }
 0x5ee   : > { %v793_v26 = vpop.xlane.xlu2 %792  ;;  %808 = vadd.xlane.f32.xlu0 %v807_v25 }
 0x5ef   : > { %v802_v27 = vmul.f32 %v1615_v53, %v793_v26 }
 0x5f1   : > { %v804_v28 = vsub.f32 %v787_v14, %v802_v27 }
 0x5f3   : > { %v806_v29 = vmul.f32 %v804_v28, %v804_v28 }
 0x5f5   : > { %v810_v30 = vsel %vm519_vm8, %v806_v29, 0.0 }
 0x5f6   : > { %811 = vadd.xlane.f32.xlu1 %v810_v30 }
 0x661   : > { %v809_v35 = vpop.xlane.xlu0 %808 }
 0x662   : > { %v813_v36 = vmul.f32 %v809_v35, %v1615_v53 }
 0x664   : > { %v815_v37 = vadd.f32 1e-12, %v813_v36 }
 0x666   : > { %1222 = vrsqrt.f32 %v815_v37  ;;  %vm823_vm12 = vweird.f32 %v815_v37 }
 0x669   : > { %v812_v38 = vpop.xlane.xlu1 %811 }
 0x66a   : > { %v814_v39 = vmul.f32 %v812_v38, %v1615_v53 }
 0x66c   : > { %v1223_v40 = vpop.eup %1222  ;;  %v816_v41 = vadd.f32 1e-12, %v814_v39 }
 0x66d   : > { %v818_v42 = vmul.f32 %v1223_v40, %v815_v37  ;;  %vm824_vm11 = vweird.f32 %v1223_v40 }
 0x66e   : > { %1224 = vrsqrt.f32 %v816_v41  ;;  %vm825_vm13 = vmor %vm823_vm12, %vm824_vm11  ;;  %vm833_vm15 = vweird.f32 %v816_v41 }
 0x66f   : > { %v819_v43 = vmul.f32 %v1223_v40, %v818_v42 }
 0x671   : > { %v820_v44 = vmul.f32 0.5, %v819_v43 }
 0x673   : > { %v821_v45 = vsub.f32 1.5, %v820_v44 }
 0x674   : > { %v1225_v46 = vpop.eup %1224 }
 0x675   : > { %v822_v47 = vmul.f32 %v1223_v40, %v821_v45  ;;  %v828_v48 = vmul.f32 %v1225_v46, %v816_v41  ;;  %vm834_vm14 = vweird.f32 %v1225_v46 }
 0x676   : > { %vm835_vm0 = vmor %vm833_vm15, %vm834_vm14 }
 0x677   : > { %v826_v50 = vsel %vm825_vm13, %v1223_v40, %v822_v47  ;;  %v829_v51 = vmul.f32 %v1225_v46, %v828_v48 }
 0x678   : > { %v837_v52 = vmul.f32 %v826_v50, %v803_v54 }
 0x679   : > { %v830_v57 = vmul.f32 0.5, %v829_v51 }
 0x67a   : > { %v840_v58 = vmul.f32 %v839_v49, %v837_v52 }
 0x67b   : > { %v831_v59 = vsub.f32 1.5, %v830_v57 }
 0x67c   : > { %v843_v60 = vadd.f32 %v842_v56, %v840_v58 }
 0x67d   : > { %v832_v61 = vmul.f32 %v1225_v46, %v831_v59 }
 0x67e   : > { %1122 = vmatmul.msk.f32.vlgmr.msrb.gmra.mxu1 %vm519_vm8, %v843_v60 }
 0x67f   : > { %v836_v62 = vsel %vm835_vm0, %v1225_v46, %v832_v61 }
 0x680   : > { %v838_v63 = vmul.f32 %v836_v62, %v804_v28 }
 0x682   : > { %v841_v0 = vmul.f32 %v839_v49, %v838_v63 }
 0x684   : > { %v844_v1 = vadd.f32 %v842_v56, %v841_v0 }
 0x686   : > { %1123 = vmatmul.msk.f32.gmra.mxu1 %vm519_vm8, %v844_v1 }
 0x6fb   : > { %v873_v11 = vpop.f32.mrf.mxu1 }
 0x6fc   : > { %v874_v12 = vadd.f32 %v873_v11, %v849_v10 }
 0x6fe   : > { %v881_v13 = vmul.f32 0.044715, %v874_v12  ;;  %v879_v25 = vmul.f32 0.5, %v874_v12 }
 0x700   : > { %v883_v14 = vmul.f32 %v881_v13, %v874_v12 }
 0x702   : > { %v885_v15 = vmul.f32 %v883_v14, %v874_v12 }
 0x703   : > { %v876_v16 = vpop.f32.mrf.mxu1 }
 0x704   : > { %v877_v17 = vadd.f32 %v876_v16, %v849_v10  ;;  %v887_v18 = vadd.f32 %v885_v15, %v874_v12 }
 0x706   : > { %v882_v19 = vmul.f32 0.044715, %v877_v17  ;;  %v889_v20 = vmul.f32 0.7978846, %v887_v18  ;;  %v880_v29 = vmul.f32 0.5, %v877_v17 }
 0x708   : > { %1226 = vtanh.f32 %v889_v20  ;;  %v884_v21 = vmul.f32 %v882_v19, %v877_v17 }
 0x70a   : > { %v886_v22 = vmul.f32 %v884_v21, %v877_v17 }
 0x70c   : > { %v888_v23 = vadd.f32 %v886_v22, %v877_v17 }
 0x70e   : > { %v1227_v54 = vpop.eup %1226  ;;  %v890_v24 = vmul.f32 0.7978846, %v888_v23 }
 0x70f   : > { %v893_v26 = vadd.f32 1.0, %v1227_v54 }
 0x710   : > { %1228 = vtanh.f32 %v890_v24 }
 0x711   : > { %v895_v27 = vmul.f32 %v893_v26, %v879_v25 }
 0x713   : > { %1124 = vmatmul.msk.f32.vlgmr.msrb.gmra.mxu3 %vm906_vm1, %v895_v27 }
 0x716   : > { %v1229_v28 = vpop.eup %1228 }
 0x717   : > { %v894_v30 = vadd.f32 1.0, %v1229_v28 }
 0x719   : > { %v896_v31 = vmul.f32 %v894_v30, %v880_v29 }
 0x71b   : > { %1125 = vmatmul.msk.f32.gmra.mxu3 %vm906_vm1, %v896_v31 }
 0x796   : > { %v930_v33 = vpop.f32.mrf.mxu3 }
 0x797   : > { %v931_v34 = vadd.f32 %v930_v33, %v905_v32 }
 0x799   : > { %v936_v35 = vadd.f32 %v931_v34, %v843_v60 }
 0x79b   : > { %v938_v36 = vsel %vm519_vm8, %v936_v35, 0.0 }
 0x79c   : > { %939 = vadd.xlane.f32.xlu2 %v938_v36 }
 0x79e   : > { %v933_v37 = vpop.f32.mrf.mxu3 }
 0x79f   : > { %v934_v38 = vadd.f32 %v933_v37, %v905_v32 }
 0x7a1   : > { %v937_v39 = vadd.f32 %v934_v38, %v844_v1 }
 0x7a3   : > { %v941_v40 = vsel %vm519_vm8, %v937_v39, 0.0 }
 0x7a4   : > { %942 = vadd.xlane.f32.xlu1 %v941_v40 }
 0x80f   : > { %v940_v41 = vpop.xlane.xlu2 %939 }
 0x810   : > { %v944_v42 = vmul.f32 %v940_v41, %v1615_v53 }
 0x812   : > { %v946_v43 = vsub.f32 %v936_v35, %v944_v42 }
 0x814   : > { %v948_v44 = vmul.f32 %v946_v43, %v946_v43 }
 0x816   : > { %v950_v45 = vsel %vm519_vm8, %v948_v44, 0.0 }
 0x817   : > { %951 = vadd.xlane.f32.xlu0 %v950_v45  ;;  %v943_v46 = vpop.xlane.xlu1 %942 }
 0x818   : > { %v945_v47 = vmul.f32 %v943_v46, %v1615_v53 }
 0x81a   : > { %v947_v48 = vsub.f32 %v937_v39, %v945_v47 }
 0x81c   : > { %v949_v49 = vmul.f32 %v947_v48, %v947_v48 }
 0x81e   : > { %v953_v50 = vsel %vm519_vm8, %v949_v49, 0.0 }
 0x81f   : > { %954 = vadd.xlane.f32.xlu2 %v953_v50 }
 0x88a   : > { %v952_v51 = vpop.xlane.xlu0 %951 }
 0x88b   : > { %v956_v52 = vmul.f32 %v952_v51, %v1615_v53 }
 0x88d   : > { %v958_v56 = vadd.f32 1e-12, %v956_v52 }
 0x88f   : > { %1230 = vrsqrt.f32 %v958_v56  ;;  %vm966_vm3 = vweird.f32 %v958_v56 }
 0x892   : > { %v955_v57 = vpop.xlane.xlu2 %954 }
 0x893   : > { %v957_v58 = vmul.f32 %v955_v57, %v1615_v53 }
 0x895   : > { %v1231_v59 = vpop.eup %1230  ;;  %v959_v60 = vadd.f32 1e-12, %v957_v58 }
 0x896   : > { %v961_v61 = vmul.f32 %v1231_v59, %v958_v56  ;;  %vm967_vm2 = vweird.f32 %v1231_v59 }
 0x897   : > { %1232 = vrsqrt.f32 %v959_v60  ;;  %vm968_vm4 = vmor %vm966_vm3, %vm967_vm2  ;;  %vm976_vm6 = vweird.f32 %v959_v60 }
 0x898   : > { %v962_v62 = vmul.f32 %v1231_v59, %v961_v61 }
 0x89a   : > { %v963_v63 = vmul.f32 0.5, %v962_v62 }
 0x89c   : > { %v964_v0 = vsub.f32 1.5, %v963_v63 }
 0x89d   : > { %v1233_v1 = vpop.eup %1232 }
 0x89e   : > { %v965_v2 = vmul.f32 %v1231_v59, %v964_v0  ;;  %v971_v3 = vmul.f32 %v1233_v1, %v959_v60  ;;  %vm977_vm5 = vweird.f32 %v1233_v1 }
 0x89f   : > { %vm978_vm7 = vmor %vm976_vm6, %vm977_vm5 }
 0x8a0   : > { %v969_v5 = vsel %vm968_vm4, %v1231_v59, %v965_v2  ;;  %v972_v6 = vmul.f32 %v1233_v1, %v971_v3 }
 0x8a1   : > { %v980_v53 = vmul.f32 %v969_v5, %v946_v43 }
 0x8a2   : > { %v973_v8 = vmul.f32 0.5, %v972_v6 }
 0x8a3   : > { %v983_v9 = vmul.f32 %v982_v4, %v980_v53 }
 0x8a4   : > { %v974_v10 = vsub.f32 1.5, %v973_v8 }
 0x8a5   : > { %v986_v11 = vadd.f32 %v985_v7, %v983_v9 }
 0x8a6   : > { %v975_v12 = vmul.f32 %v1233_v1, %v974_v10 }
 0x8a7   : > { %988 = vst.msk [vmem:[%s1681_s9] sm:$0xff] %vm519_vm8, %v986_v11 }
 0x8a8   : > { %v979_v13 = vsel %vm978_vm7, %v1233_v1, %v975_v12 }
 0x8a9   : > { %v981_v14 = vmul.f32 %v979_v13, %v947_v48 }
 0x8ab   : > { %v984_v15 = vmul.f32 %v982_v4, %v981_v14 }
 0x8ad   : > { %v987_v16 = vadd.f32 %v985_v7, %v984_v15 }
 0x8af   : > { %989 = vst.msk [vmem:[%s1681_s9 + $0x8] sm:$0xff] %vm519_vm8, %v987_v16 }
 0x8b0 PF: > { %s1698_s12 = sld [smem:[#allocation9_spill]]  ;;  %s1701_s30 = smov %s1324_s10 }
 0x8b1   : > { %s1699_s22 = sld [smem:[#allocation8_spill]] }
 0x8b2   : > { %s1700_s11 = sld [smem:[#allocation10_spill]] }
 0x8b6   : > { %p22_p11 = scmp.ge.s32.totalorder %s1698_s12, 4  }
 0x8b7   : > { %s1702_s10 = smov %s1699_s22 }
 0x8b8   :  { %24 = sbr.rel (!%p22_p11) target bundleno = 7 (0x7), region = 118 }
 0x8bd   :  { %1001 = vsyncpa [#allocation3], 1 }
 0x8be   :  { %1003 = vsyncpa [#allocation3 + $0x1], 1 }
 0x8bf   :  { %1004 = vsyncpa [#allocation5], 1 }
 0x8c0   :  { %1006 = vsyncpa [#allocation5 + $0x1], 1 }

</bundles_post_ra>
